<compile_context>
chip_gen: v5e
topology: v5e:2x2
jax: 0.10.0
libtpu: 0.0.40
codegen_flags: <defaults>
</compile_context>

<pallas_src>
import jax
import jax.numpy as jnp
from jax import lax
from jax.experimental import pallas as pl
from jax.experimental.pallas import tpu as pltpu


def _rc_feature_kernel(blk_lo_ref, blk_hi_ref,            # scalar-prefetch (SMEM)
                       seq_ref, starts_ref, ends_ref, ent_ref,
                       out_ref, acc_ref):
    """Grid: (batch_blocks, seq_blocks).

    blk_lo_ref : SMEM [nb] int32  first seq-block covering any span of this batch block
    blk_hi_ref : SMEM [nb] int32  last  seq-block covering any span of this batch block
    seq_ref    : VMEM [TB, TS, H] native dtype (e.g. bf16), data-dependent block
    starts_ref : VMEM [TB, 8] int32 (col 0 = span1 start, col 1 = span2 start)
    ends_ref   : VMEM [TB, 8] int32 (col 0 = span1 end,   col 1 = span2 end)
    ent_ref    : VMEM [TB, 2H]    pre-gathered entity embeddings (native dtype)
    out_ref    : VMEM [TB, 2H]    f32 output block
    acc_ref    : VMEM [TB, 8, H]  f32 span-sum accumulator (scratch)
    """
    b = pl.program_id(0)
    si = pl.program_id(1)
    ns = pl.num_programs(1)
    TB, TS, H = seq_ref.shape

    lo = blk_lo_ref[b]
    hi = blk_hi_ref[b]
    cur = jnp.minimum(lo + si, hi)        # actual fetched seq block (matches index_map)

    @pl.when(si == 0)
    def _init():
        acc_ref[...] = jnp.zeros_like(acc_ref)

    # Only steps that brought a fresh, span-covering block do any work; all other
    # steps have their DMA elided (repeated block index) and skip compute entirely.
    @pl.when(lo + si <= hi)
    def _accum():
        s_off = cur * TS
        starts = starts_ref[...]                                  # [TB, 8] int32
        ends = ends_ref[...]                                      # [TB, 8] int32
        pos = lax.broadcasted_iota(jnp.int32, (TB, 8, TS), 2) + s_off
        mask = ((pos >= starts[:, :, None]) & (pos < ends[:, :, None]))
        mask = mask.astype(seq_ref.dtype)                         # exact 0/1
        # Both span sums in a single MXU batched matmul, f32 accumulation.
        acc_ref[...] += jnp.einsum(
            "tks,tsh->tkh", mask, seq_ref[...],
            preferred_element_type=jnp.float32)

    @pl.when(si == ns - 1)
    def _finalize():
        starts = starts_ref[...]
        ends = ends_ref[...]
        cnt = jnp.maximum(ends[:, 0:2] - starts[:, 0:2], 1).astype(jnp.float32)  # [TB, 2]
        ent = ent_ref[...].astype(jnp.float32)                                   # [TB, 2H]
        # Divide only the two live rows; two direct stores (no concat relayout).
        out_ref[:, :H] = acc_ref[:, 0, :] / cnt[:, 0:1] + ent[:, :H]
        out_ref[:, H:] = acc_ref[:, 1, :] / cnt[:, 1:2] + ent[:, H:]


def _pick_tiles(B, S, H, seq_itemsize, ent_itemsize):
    """VMEM- and generation-aware (TB, TS) picker. Returns (TB, TS, vmem_limit)."""
    try:
        vmem_cap = int(pltpu.get_tpu_info().vmem_capacity_bytes)
    except Exception:  # conservative fallback = v7x per-TC VMEM
        vmem_cap = 64 * 1024 * 1024
    # ~70% of physical, capped at ~45 MiB (safe on v7x, above v5e/v6e defaults).
    budget = min(int(0.70 * vmem_cap), 45 * 1024 * 1024)

    # TB: multiples of 8 dividing B (keeps (8,128) tiling clean); prefer >= 2
    # batch blocks so v7x megacore can shard the parallel axis.  Fallback TB=B.
    tb_cands = [c for c in (32, 16, 8) if c <= B and B % c == 0]
    pref = [c for c in tb_cands if B // c >= 2]
    tb_cands = (pref or tb_cands) or [B]

    ts_cands = [c for c in (1024, 512, 256, 128, 64, 32, 16, 8)
                if c <= S and S % c == 0] or [S]
    ts_max = ts_cands[0]

    def usage(tb, ts):
        return (2 * tb * ts * H * seq_itemsize            # seq block, double-buffered
                + tb * 8 * H * 4                          # f32 accumulator scratch
                + 2 * tb * 2 * H * (ent_itemsize + 4)     # ent in + f32 out, double-buffered
                + 4 * tb * 8 * 4)                         # span starts/ends blocks

    best = None
    for tb in tb_cands:                   # descending: shrink TB before TS < 512
        for ts in ts_cands:               # descending: biggest TS that fits
            if usage(tb, ts) <= budget:
                if ts >= 512 or ts == ts_max:
                    return tb, ts, budget
                if best is None or ts > best[1]:
                    best = (tb, ts)
                break
    if best is None:
        best = (tb_cands[-1], ts_cands[-1])
    return best[0], best[1], budget


def rc_feature_extractor(sequence_output, entity1_span, entity2_span,
                         entity_ids, entity_embedding_table):
    """Returns relation-classification features of shape [B, 2*H] (float32)."""
    B, S, H = sequence_output.shape

    e1 = entity1_span.astype(jnp.int32)
    e2 = entity2_span.astype(jnp.int32)

    TB, TS, vmem_limit = _pick_tiles(B, S, H,
                                     sequence_output.dtype.itemsize,
                                     entity_embedding_table.dtype.itemsize)
    nb, ns = B // TB, S // TS
    # TODO(synk): non-divisible B/S falls back to a single block along that axis
    # (correct, but no megacore split / no DMA savings); add a padding path if needed.

    # Span starts/ends packed [B, 8] (rows 0/1 live, rest zero padding so mask
    # rows 2..7 are all-false in the MXU mask-matmul).
    pad = jnp.zeros((B, 6), jnp.int32)
    starts = jnp.concatenate([e1[:, 0:1], e2[:, 0:1], pad], axis=1)   # [B, 8]
    ends = jnp.concatenate([e1[:, 1:2], e2[:, 1:2], pad], axis=1)     # [B, 8]

    # Per-batch-block coverage (union of both spans of all TB rows) in seq-block
    # units, for the data-dependent sequence index_map.  Clipped for DMA safety.
    s_all = jnp.stack([e1[:, 0], e2[:, 0]], axis=1)                    # [B, 2]
    en_all = jnp.stack([e1[:, 1], e2[:, 1]], axis=1)                   # [B, 2]
    last_tok = jnp.maximum(en_all - 1, s_all)                          # empty-span safe
    blk_lo = jnp.clip(jnp.min(s_all.reshape(nb, TB * 2), axis=1) // TS,
                      0, ns - 1).astype(jnp.int32)                     # [nb]
    blk_hi = jnp.clip(jnp.max(last_tok.reshape(nb, TB * 2), axis=1) // TS,
                      0, ns - 1).astype(jnp.int32)                     # [nb]
    blk_hi = jnp.maximum(blk_hi, blk_lo)

    # Glue: entity-id -> embedding gather stays in plain JAX, laid out lane-dense.
    ent = jnp.take(entity_embedding_table, entity_ids, axis=0)         # [B, 2, H]
    ent = ent.reshape(B, 2 * H)

    grid_spec = pltpu.PrefetchScalarGridSpec(
        num_scalar_prefetch=2,
        grid=(nb, ns),
        in_specs=[
            # Data-dependent sequence block: clamp into the span-coverage range so
            # steps past blk_hi repeat the same block index and their DMA is elided.
            pl.BlockSpec((TB, TS, H),
                         lambda b, s, lo, hi: (b, jnp.minimum(lo[b] + s, hi[b]), 0)),
            pl.BlockSpec((TB, 8), lambda b, s, lo, hi: (b, 0)),        # span starts
            pl.BlockSpec((TB, 8), lambda b, s, lo, hi: (b, 0)),        # span ends
            pl.BlockSpec((TB, 2 * H), lambda b, s, lo, hi: (b, 0)),    # entity embeddings
        ],
        out_specs=pl.BlockSpec((TB, 2 * H), lambda b, s, lo, hi: (b, 0)),
        scratch_shapes=[pltpu.VMEM((TB, 8, H), jnp.float32)],
    )

    out = pl.pallas_call(
        _rc_feature_kernel,
        out_shape=jax.ShapeDtypeStruct((B, 2 * H), jnp.float32),
        grid_spec=grid_spec,
        compiler_params=pltpu.CompilerParams(
            dimension_semantics=("parallel", "arbitrary"),
            vmem_limit_bytes=vmem_limit),
    )(blk_lo, blk_hi, sequence_output, starts, ends, ent)
    return out


def _reference(sequence_output, entity1_span, entity2_span, entity_ids, table):
    """Pure-JAX reference (f32 math on the same input values)."""
    B, S, H = sequence_output.shape
    x = sequence_output.astype(jnp.float32)
    pos = jnp.arange(S)

    def pool(span):
        m = (pos[None, :] >= span[:, 0:1]) & (pos[None, :] < span[:, 1:2])   # [B, S]
        ssum = jnp.sum(jnp.where(m[:, :, None], x, 0.0), axis=1)             # [B, H]
        cnt = jnp.maximum(span[:, 1] - span[:, 0], 1).astype(jnp.float32)
        return ssum / cnt[:, None]

    ent = jnp.take(table, entity_ids, axis=0).astype(jnp.float32)            # [B, 2, H]
    f1 = pool(entity1_span) + ent[:, 0, :]
    f2 = pool(entity2_span) + ent[:, 1, :]
    return jnp.concatenate([f1, f2], axis=-1)


if __name__ == "__main__":
    key = jax.random.PRNGKey(0)
    B, S, H = 2, 8, 128
    NUM_ENTITIES = 16

    k_seq, k_tab = jax.random.split(key)
    sequence_output = jax.random.normal(k_seq, (B, S, H)).astype(jnp.bfloat16)
    entity_embedding_table = (
        jax.random.normal(k_tab, (NUM_ENTITIES, H)) * 0.02).astype(jnp.bfloat16)

    entity1_span = jnp.array([[1, 3], [0, 2]], dtype=jnp.int32)   # [start, end)
    entity2_span = jnp.array([[4, 7], [5, 8]], dtype=jnp.int32)
    entity_ids = jnp.array([[3, 7], [1, 2]], dtype=jnp.int32)

    out = rc_feature_extractor(sequence_output, entity1_span, entity2_span,
                               entity_ids, entity_embedding_table)
    out = jax.block_until_ready(out)

    ref = _reference(sequence_output, entity1_span, entity2_span,
                     entity_ids, entity_embedding_table)
    assert out.shape == (B, 2 * H)
    assert jnp.allclose(out, ref, atol=1e-4, rtol=1e-4), (
        float(jnp.max(jnp.abs(out - ref))))

    print("KERNEL_OK")
</pallas_src>

<mosaic_0001>
module attributes {stable_mosaic.version = 11 : i64} {
  func.func @_rc_feature_kernel(%arg0: i32, %arg1: i32, %arg2: memref<1xi32, #tpu.memory_space<smem>>, %arg3: memref<1xi32, #tpu.memory_space<smem>>, %arg4: memref<2x8x128xbf16, #tpu.memory_space<vmem>>, %arg5: memref<2x8xi32, #tpu.memory_space<vmem>>, %arg6: memref<2x8xi32, #tpu.memory_space<vmem>>, %arg7: memref<2x256xbf16, #tpu.memory_space<vmem>>, %arg8: memref<2x256xf32, #tpu.memory_space<vmem>>, %arg9: memref<2x8x128xf32, #tpu.memory_space<vmem>>) attributes {dimension_semantics = [#tpu.dimension_semantics<parallel>, #tpu.dimension_semantics<arbitrary>], iteration_bounds = array<i64: 1, 1>, scalar_prefetch = 2 : i64, scratch_operands = 1 : i64, tpu.core_type = #tpu.core_type<tc>, window_params = [{transform_indices = @transform_0, window_bounds = array<i64: 2, 8, 128>}, {transform_indices = @transform_1, window_bounds = array<i64: 2, 8>}, {transform_indices = @transform_2, window_bounds = array<i64: 2, 8>}, {transform_indices = @transform_3, window_bounds = array<i64: 2, 256>}, {transform_indices = @transform_4, window_bounds = array<i64: 2, 256>}]} {
    %0 = arith.index_cast %arg0 : i32 to index
    %1 = memref.load %arg2[%0] : memref<1xi32, #tpu.memory_space<smem>>
    %2 = arith.index_cast %arg0 : i32 to index
    %3 = memref.load %arg3[%2] : memref<1xi32, #tpu.memory_space<smem>>
    %4 = arith.addi %1, %arg1 : i32
    %5 = arith.minsi %4, %3 : i32
    %c0_i32 = arith.constant 0 : i32
    %6 = arith.cmpi eq, %arg1, %c0_i32 : i32
    %7 = arith.extui %6 : i1 to i32
    %c0_i32_0 = arith.constant 0 : i32
    %8 = arith.cmpi ne, %7, %c0_i32_0 : i32
    scf.if %8 {
      %cst = arith.constant 0.000000e+00 : f32
      %16 = vector.broadcast %cst : f32 to vector<2x8x128xf32>
      %c0 = arith.constant 0 : index
      %c0_4 = arith.constant 0 : index
      %c0_5 = arith.constant 0 : index
      %17 = vector.load %arg9[%c0, %c0_4, %c0_5] : memref<2x8x128xf32, #tpu.memory_space<vmem>>, vector<2x8x128xf32>
      tpu.vector_store %arg9[%c0, %c0_4, %c0_5], %16 {strides = array<i32>} : memref<2x8x128xf32, #tpu.memory_space<vmem>>, vector<2x8x128xf32>,
    } else {
    }
    %9 = arith.addi %1, %arg1 : i32
    %10 = arith.cmpi sle, %9, %3 : i32
    %11 = arith.extui %10 : i1 to i32
    %c0_i32_1 = arith.constant 0 : i32
    %12 = arith.cmpi ne, %11, %c0_i32_1 : i32
    scf.if %12 {
      %c8_i32 = arith.constant 8 : i32
      %16 = arith.muli %5, %c8_i32 : i32
      %c0 = arith.constant 0 : index
      %c0_4 = arith.constant 0 : index
      %17 = vector.load %arg5[%c0, %c0_4] : memref<2x8xi32, #tpu.memory_space<vmem>>, vector<2x8xi32>
      %c0_5 = arith.constant 0 : index
      %c0_6 = arith.constant 0 : index
      %18 = vector.load %arg6[%c0_5, %c0_6] : memref<2x8xi32, #tpu.memory_space<vmem>>, vector<2x8xi32>
      %19 = tpu.iota {dimensions = array<i32: 2>} : vector<2x8x8xi32>
      %20 = vector.broadcast %16 : i32 to vector<2x8x8xi32>
      %21 = arith.addi %19, %20 : vector<2x8x8xi32>
      %22 = vector.shape_cast %17 : vector<2x8xi32> to vector<2x8x1xi32>
      %23 = vector.broadcast %22 : vector<2x8x1xi32> to vector<2x8x8xi32>
      %24 = arith.cmpi sge, %21, %23 : vector<2x8x8xi32>
      %25 = vector.shape_cast %18 : vector<2x8xi32> to vector<2x8x1xi32>
      %26 = vector.broadcast %25 : vector<2x8x1xi32> to vector<2x8x8xi32>
      %27 = arith.cmpi slt, %21, %26 : vector<2x8x8xi32>
      %28 = arith.andi %24, %27 : vector<2x8x8xi1>
      %29 = arith.extui %28 : vector<2x8x8xi1> to vector<2x8x8xi32>
      %30 = arith.sitofp %29 : vector<2x8x8xi32> to vector<2x8x8xf32>
      %31 = arith.truncf %30 : vector<2x8x8xf32> to vector<2x8x8xbf16>
      %c0_7 = arith.constant 0 : index
      %c0_8 = arith.constant 0 : index
      %c0_9 = arith.constant 0 : index
      %32 = vector.load %arg9[%c0_7, %c0_8, %c0_9] : memref<2x8x128xf32, #tpu.memory_space<vmem>>, vector<2x8x128xf32>
      %c0_10 = arith.constant 0 : index
      %c0_11 = arith.constant 0 : index
      %c0_12 = arith.constant 0 : index
      %33 = vector.load %arg4[%c0_10, %c0_11, %c0_12] : memref<2x8x128xbf16, #tpu.memory_space<vmem>>, vector<2x8x128xbf16>
      "tpu.trace_start"() <{level = 10 : i32, message = "tks,tsh->tkh"}> : () -> ()
      %cst = arith.constant dense<0.000000e+00> : vector<2x8x128xf32>
      %34 = tpu.matmul %31, %33, %cst {dimension_numbers = #tpu.dot_dimension_numbers<[2], [1], [1], [2], [0, 0, 0, 1, 1, 2], [0], [0]>} : vector<2x8x8xbf16>, vector<2x8x128xbf16>, vector<2x8x128xf32> -> vector<2x8x128xf32>
      "tpu.trace_stop"() : () -> ()
      %35 = arith.addf %32, %34 : vector<2x8x128xf32>
      %c0_13 = arith.constant 0 : index
      %c0_14 = arith.constant 0 : index
      %c0_15 = arith.constant 0 : index
      %36 = vector.load %arg9[%c0_13, %c0_14, %c0_15] : memref<2x8x128xf32, #tpu.memory_space<vmem>>, vector<2x8x128xf32>
      tpu.vector_store %arg9[%c0_13, %c0_14, %c0_15], %35 {strides = array<i32>} : memref<2x8x128xf32, #tpu.memory_space<vmem>>, vector<2x8x128xf32>,
    } else {
    }
    %c0_i32_2 = arith.constant 0 : i32
    %13 = arith.cmpi eq, %arg1, %c0_i32_2 : i32
    %14 = arith.extui %13 : i1 to i32
    %c0_i32_3 = arith.constant 0 : i32
    %15 = arith.cmpi ne, %14, %c0_i32_3 : i32
    scf.if %15 {
      %c0 = arith.constant 0 : index
      %c0_4 = arith.constant 0 : index
      %16 = vector.load %arg5[%c0, %c0_4] : memref<2x8xi32, #tpu.memory_space<vmem>>, vector<2x8xi32>
      %c0_5 = arith.constant 0 : index
      %c0_6 = arith.constant 0 : index
      %17 = vector.load %arg6[%c0_5, %c0_6] : memref<2x8xi32, #tpu.memory_space<vmem>>, vector<2x8xi32>
      %18 = vector.extract_strided_slice %17 {offsets = [0, 0], sizes = [2, 2], strides = [1, 1]} : vector<2x8xi32> to vector<2x2xi32>
      %19 = vector.extract_strided_slice %16 {offsets = [0, 0], sizes = [2, 2], strides = [1, 1]} : vector<2x8xi32> to vector<2x2xi32>
      %20 = arith.subi %18, %19 : vector<2x2xi32>
      %c1_i32 = arith.constant 1 : i32
      %21 = vector.broadcast %c1_i32 : i32 to vector<2x2xi32>
      %22 = arith.maxsi %20, %21 : vector<2x2xi32>
      %23 = arith.sitofp %22 : vector<2x2xi32> to vector<2x2xf32>
      %c0_7 = arith.constant 0 : index
      %c0_8 = arith.constant 0 : index
      %24 = vector.load %arg7[%c0_7, %c0_8] : memref<2x256xbf16, #tpu.memory_space<vmem>>, vector<2x256xbf16>
      %25 = arith.extf %24 : vector<2x256xbf16> to vector<2x256xf32>
      %c0_9 = arith.constant 0 : index
      %c0_10 = arith.constant 0 : index
      %c0_11 = arith.constant 0 : index
      %26 = vector.load %arg9[%c0_9, %c0_10, %c0_11] : memref<2x8x128xf32, #tpu.memory_space<vmem>>, vector<2x1x128xf32>
      %27 = vector.shape_cast %26 : vector<2x1x128xf32> to vector<2x128xf32>
      %28 = vector.extract_strided_slice %23 {offsets = [0, 0], sizes = [2, 1], strides = [1, 1]} : vector<2x2xf32> to vector<2x1xf32>
      %29 = vector.broadcast %28 : vector<2x1xf32> to vector<2x128xf32>
      %30 = arith.divf %27, %29 : vector<2x128xf32>
      %31 = vector.extract_strided_slice %25 {offsets = [0, 0], sizes = [2, 128], strides = [1, 1]} : vector<2x256xf32> to vector<2x128xf32>
      %32 = arith.addf %30, %31 : vector<2x128xf32>
      %c0_12 = arith.constant 0 : index
      %c0_13 = arith.constant 0 : index
      %33 = vector.load %arg8[%c0_12, %c0_13] : memref<2x256xf32, #tpu.memory_space<vmem>>, vector<2x128xf32>
      tpu.vector_store %arg8[%c0_12, %c0_13], %32 {strides = array<i32>} : memref<2x256xf32, #tpu.memory_space<vmem>>, vector<2x128xf32>,
      %c0_14 = arith.constant 0 : index
      %c1 = arith.constant 1 : index
      %c0_15 = arith.constant 0 : index
      %34 = vector.load %arg9[%c0_14, %c1, %c0_15] : memref<2x8x128xf32, #tpu.memory_space<vmem>>, vector<2x1x128xf32>
      %35 = vector.shape_cast %34 : vector<2x1x128xf32> to vector<2x128xf32>
      %36 = vector.extract_strided_slice %23 {offsets = [0, 1], sizes = [2, 1], strides = [1, 1]} : vector<2x2xf32> to vector<2x1xf32>
      %37 = vector.broadcast %36 : vector<2x1xf32> to vector<2x128xf32>
      %38 = arith.divf %35, %37 : vector<2x128xf32>
      %39 = vector.extract_strided_slice %25 {offsets = [0, 128], sizes = [2, 128], strides = [1, 1]} : vector<2x256xf32> to vector<2x128xf32>
      %40 = arith.addf %38, %39 : vector<2x128xf32>
      %c0_16 = arith.constant 0 : index
      %c128 = arith.constant 128 : index
      %41 = vector.load %arg8[%c0_16, %c128] : memref<2x256xf32, #tpu.memory_space<vmem>>, vector<2x128xf32>
      tpu.vector_store %arg8[%c0_16, %c128], %40 {strides = array<i32>} : memref<2x256xf32, #tpu.memory_space<vmem>>, vector<2x128xf32>,
    } else {
    }
    return
  }
  func.func @transform_0(%arg0: i32, %arg1: i32, %arg2: memref<1xi32, #tpu.memory_space<smem>>, %arg3: memref<1xi32, #tpu.memory_space<smem>>) -> (i32, i32, i32) {
    %0 = arith.index_cast %arg0 : i32 to index
    %1 = memref.load %arg2[%0] : memref<1xi32, #tpu.memory_space<smem>>
    %2 = arith.addi %1, %arg1 : i32
    %3 = arith.index_cast %arg0 : i32 to index
    %4 = memref.load %arg3[%3] : memref<1xi32, #tpu.memory_space<smem>>
    %5 = arith.minsi %2, %4 : i32
    %c0_i32 = arith.constant 0 : i32
    %c0_i32_0 = arith.constant 0 : i32
    return %arg0, %5, %c0_i32 : i32, i32, i32
  }
  func.func @transform_1(%arg0: i32, %arg1: i32, %arg2: memref<1xi32, #tpu.memory_space<smem>>, %arg3: memref<1xi32, #tpu.memory_space<smem>>) -> (i32, i32) {
    %c0_i32 = arith.constant 0 : i32
    %c0_i32_0 = arith.constant 0 : i32
    return %arg0, %c0_i32 : i32, i32
  }
  func.func @transform_2(%arg0: i32, %arg1: i32, %arg2: memref<1xi32, #tpu.memory_space<smem>>, %arg3: memref<1xi32, #tpu.memory_space<smem>>) -> (i32, i32) {
    %c0_i32 = arith.constant 0 : i32
    %c0_i32_0 = arith.constant 0 : i32
    return %arg0, %c0_i32 : i32, i32
  }
  func.func @transform_3(%arg0: i32, %arg1: i32, %arg2: memref<1xi32, #tpu.memory_space<smem>>, %arg3: memref<1xi32, #tpu.memory_space<smem>>) -> (i32, i32) {
    %c0_i32 = arith.constant 0 : i32
    %c0_i32_0 = arith.constant 0 : i32
    return %arg0, %c0_i32 : i32, i32
  }
  func.func @transform_4(%arg0: i32, %arg1: i32, %arg2: memref<1xi32, #tpu.memory_space<smem>>, %arg3: memref<1xi32, #tpu.memory_space<smem>>) -> (i32, i32) {
    %c0_i32 = arith.constant 0 : i32
    %c0_i32_0 = arith.constant 0 : i32
    return %arg0, %c0_i32 : i32, i32
  }
}

</mosaic_0001>

<bundles_post_ra>
// kernel: tpu_custom_call.1
= control target key start
LH: loop header
LB: loop body
LE: loop exit
PB: predicated region body
PF: predicated region fallthrough
CT: control target
= control target key end

     0   :  { %13 = vsyncpa [#allocation7], 0  ;;  %s502_s0 = inlined_call_operand.<no memory space> [shape: s32[1], index: 0, kind: input, shape index: {}]   ;;  %s503_s1 = inlined_call_operand.<no memory space> [shape: s32[1], index: 1, kind: input, shape index: {}]   ;;  %s504_s2 = inlined_call_operand.hbm [shape: bf16[2,8,128], index: 2, kind: input, shape index: {}]   ;;  %s505_s3 = inlined_call_operand.vmem [shape: s32[2,8], index: 3, kind: input, shape index: {}]   ;;  %s506_s4 = inlined_call_operand.vmem [shape: s32[2,8], index: 4, kind: input, shape index: {}]   ;;  %s507_s5 = inlined_call_operand.vmem [shape: bf16[2,256], index: 5, kind: input, shape index: {}]   ;;  %s508_s6 = inlined_call_operand.hbm [shape: f32[2,256], index: 6, kind: output, shape index: {}]  }
   0x1   :  { %14 = vsyncpa [#allocation8], 0  ;;  %p20_p0 = scmp.lt.s32.totalorder %s502_s0, %s503_s1  ;;  %s390_s25 = smov [#allocation6]  }
   0x2   :  { %s28_s26 = sshll.u32 %s390_s25, 4  ;;  %s342_s17 = scalar_lea.hbm %s504_s2, 8  ;;  %s29_s26 = int_to_ptr.vmem [resolvable:$true] %s28_s26 }
   0x3   :  { %s445_s7 = scalar_select %p20_p0, %s502_s0, %s503_s1 }
   0x5   :  { %s311_s8 = sshll.u32 %s445_s7, 2 }
   0x6   :  { %s25_s11 = scalar_lea.hbm %s504_s2, %s311_s8 }
   0x7   :  { %s26_s12 = sshll.u32 %s25_s11, 4  ;;  %s27_s12 = int_to_ptr.hbm [resolvable:$true] %s26_s12 }
   0x8   :  { %s338_s13 = sshra.s32 %s27_s12, 4  ;;  %s339_s13 = int_to_ptr.hbm [resolvable:$true] %s338_s13 }
   0x9   :  { %s340_s14 = scalar_lea.hbm %s339_s13, 8  ;;  %p343_p2 = scmp.lt.s32.totalorder %s339_s13, %s504_s2 }
   0xa   :  { %p341_p1 = scmp.ne.s32.totalorder %s339_s13, %s340_s14  ;;  %p344_p3 = scmp.lt.s32.totalorder %s342_s17, %s340_s14 }
   0xc   :  { %p345_p4 = por %p344_p3, %p343_p2 }
   0xe   :  { %p346_p5 = pnand %p345_p4, %p341_p1 }
  0x10   :  { %349 = shalt.err (!%p346_p5)
}
  0x11   :  { %s391_s20 = smov 64   ;;  %s392_s21 = smov 4  }
  0x12   :  { %34 = dma.hbm_to_vmem [thread:$0]  %s27_s12, 128, %s29_s26, [#allocation7], %s391_s20, %s391_s20, %s392_s21  }
  0x13   :  { %386 = dma.done.wait [#allocation7], 128  }
  0x14   :  { %387 = vsyncadd [#allocation7], 4294967168  ;;  %v393_v0 = vmov 0.0   ;;  %p312_p6 = scmp.gt.s32.totalorder %s502_s0, %s503_s1 }
  0x15   :  { %60 = vst [vmem:[#allocation2] sm:$0xff] %v393_v0  ;;  %s313_s0 = sshll.u32 (!%p312_p6), %s445_s7, 3 }
  0x16   :  { %61 = vst [vmem:[#allocation2 + $0x8] sm:$0xff] %v393_v0  ;;  %65 = sbr.rel (%p312_p6) target bundleno = 301 (0x12d), region = 29 }
  0x1b   :  { %v69_v1 = vlaneseq  ;;  %v68_v3 = vld [vmem:[%s506_s4] sm:$0x3]  ;;  %v115_v9 = vld [vmem:[#allocation6] sm:$0xf]  ;;  %vm121_vm0 = vcmask 1043456   ;;  %v71_v14 = vstv %s313_s0  ;;  %v394_v18 = vmov 0.0  }
  0x1c   :  { %v67_v4 = vld [vmem:[%s505_s3] sm:$0x3]  ;;  %v89_v5 = vperm.slane %v68_v3, 0  ;;  %v96_v7 = vperm.slane %v68_v3, 1  ;;  %v123_v10 = vsel %vm121_vm0, %v115_v9, 0  ;;  %vm117_vm4 = vcmask 64512  }
  0x1d   :  { %v75_v2 = vshrl.u32 %v69_v1, 7  ;;  %v73_v6 = vperm.slane %v67_v4, 0  ;;  %v80_v8 = vperm.slane %v67_v4, 1  ;;  %132 = vmatpush.bf16.msra.mxu0 %v123_v10  ;;  %v116_v11 = vld [vmem:[#allocation6 + $0x4] sm:$0xf]  ;;  %v70_v13 = vand.u32 127, %v69_v1 }
  0x1e   :  { %v142_v12 = vsel %vm121_vm0, %v116_v11, 0  ;;  %v113_v25 = vld [vmem:[#allocation2] sm:$0xff]  ;;  %v114_v28 = vld [vmem:[#allocation2 + $0x8] sm:$0xff] }
  0x1f   :  { %327 = vset.pattern.permute.xlu1 %v75_v2  ;;  %326 = vset.pattern.permute.xlu0 %v75_v2  ;;  %v72_v15 = vadd.s32 %v71_v14, %v70_v13 }
  0x20   :  { %151 = vmatpush.bf16.msra.mxu1 %v142_v12 }
  0x27   :  { %94 = vperm.xlu1 %327, %v89_v5   ;;  %78 = vperm.xlu0 %326, %v73_v6  }
  0x2f   :  { %101 = vperm.xlu1 %327, %v96_v7   ;;  %85 = vperm.xlu0 %326, %v80_v8  }
  0x99   :  { %v95_v16 = vpop.permute.xlu1 %94  ;;  %v79_v17 = vpop.permute.xlu0 %78 }
  0x9a   :  { %vm103_vm1 = vcmp.lt.s32.totalorder %v72_v15, %v95_v16  ;;  %vm87_vm2 = vcmp.ge.s32.totalorder %v72_v15, %v79_v17 }
  0x9b   :  { %vm105_vm3 = vmand %vm87_vm2, %vm103_vm1 }
  0x9c   :  { %v314_v19 = vsel %vm105_vm3, 1.0, %v394_v18 }
  0x9d   :  { %v111_v20 = vpack.c.bf16 %v314_v19, %v314_v19 }
  0x9f   :  { %316 = vmatmul.msk.bf16.vlgmr.msra.gmra.mxu0 %vm117_vm4, %v111_v20 }
  0xa1   :  { %v102_v21 = vpop.permute.xlu1 %101  ;;  %v86_v22 = vpop.permute.xlu0 %85 }
  0xa2   :  { %vm104_vm5 = vcmp.lt.s32.totalorder %v72_v15, %v102_v21  ;;  %vm88_vm6 = vcmp.ge.s32.totalorder %v72_v15, %v86_v22 }
  0xa3   :  { %vm106_vm7 = vmand %vm88_vm6, %vm104_vm5 }
  0xa4   :  { %v315_v23 = vsel %vm106_vm7, 1.0, %v394_v18 }
  0xa5   :  { %v112_v24 = vpack.c.bf16 %v315_v23, %v315_v23 }
  0xa7   :  { %317 = vmatmul.msk.bf16.vlgmr.msra.gmra.mxu1 %vm117_vm4, %v112_v24 }
 0x11c   :  { %v134_v26 = vpop.f32.mrf.mxu0 }
 0x11d   :  { %v157_v27 = vadd.f32 %v134_v26, %v113_v25 }
 0x11f   :  { %159 = vst [vmem:[#allocation2] sm:$0xff] %v157_v27 }
 0x124   :  { %v136_v29 = vpop.f32.mrf.mxu0  ;;  %v153_v30 = vpop.f32.mrf.mxu1 }
 0x125   :  { %v158_v31 = vadd.f32 %v153_v30, %v114_v28 }
 0x127   :  { %160 = vst [vmem:[#allocation2 + $0x8] sm:$0xff] %v158_v31 }
 0x12c   :  { %v155_v32 = vpop.f32.mrf.mxu1 }
 0x12d PF:  { %v164_v33 = vld [vmem:[%s505_s3] sm:$0x3]  ;;  %v395_v35 = vmov 0   ;;  %v396_v39 = vmov 1   ;;  %vm226_vm1 = vcmask 1041409   ;;  %vm228_vm4 = vcmask 1043459  }
 0x12e   :  { %v165_v34 = vld [vmem:[%s506_s4] sm:$0x3]  ;;  %328 = vset.pattern.permute.xlu0 %v395_v35  ;;  %v172_v0 = vld [vmem:[#allocation2] sm:$0x1]  ;;  %vm230_vm7 = vcmask 1045509   ;;  %s397_s3 = smov [#allocation9]  }
 0x12f   :  { %v166_v36 = vsub.s32 %v165_v34, %v164_v33  ;;  %v170_v40 = vld [vmem:[%s507_s5] sm:$0x3]  ;;  %v173_v3 = vld [vmem:[#allocation2 + $0x8] sm:$0x1]  ;;  %v236_v28 = vld [vmem:[#allocation2 + $0x1] sm:$0x1] }
 0x130   :  { %v171_v41 = vunpack.c.l.bf16 %v170_v40  ;;  %v237_v31 = vld [vmem:[#allocation2 + $0x9] sm:$0x1]  ;;  %s297_s4 = sshll.u32 %s397_s3, 4  ;;  %s299_s11 = sshll.u32 %s508_s6, 4  ;;  %s298_s4 = int_to_ptr.vmem [resolvable:$true] %s297_s4  ;;  %s300_s11 = int_to_ptr.hbm [resolvable:$true] %s299_s11 }
 0x131   :  { %vm167_vm8 = vcmp.gt.s32.totalorder %v166_v36, 1 }
 0x132   :  { %v168_v37 = vsel %vm167_vm8, %v166_v36, 1  ;;  %212 = vst [vmem:[#allocation1] ss:$4 sm:$0xff] %v171_v41 }
 0x133   :  { %v169_v38 = vcvt.s32.f32 %v168_v37 }
 0x135   :  { %176 = vperm.xlu0 %328, %v169_v38  }
 0x139   :  { %v479_v42 = vld.sshfl [vmem:[#allocation1] sm:$0xff pattern:$0x73625140] }
 0x13a   :  { %274 = vst [vmem:[#allocation1] ss:$4 sm:$0xff] %v171_v41  ;;  %v214_v7 = vrot.slane %v479_v42, 1 }
 0x13d   :  { %329 = vset.pattern.permute.xlu0 %v396_v39 }
 0x13e   :  { %239 = vperm.xlu0 %329, %v169_v38  }
 0x141   :  { %v275_v22 = vld.sshfl [vmem:[#allocation1 + $0x8] sm:$0xff pattern:$0x73625140] }
 0x142   :  { %v276_v35 = vrot.slane %v275_v22, 1 }
 0x1a7   :  { %v177_v43 = vpop.permute.xlu0 %176 }
 0x1a8   :  { %v178_v44 = vrot.slane %v177_v43, 1  ;;  %330 = vrcp.f32 %v177_v43  ;;  %v190_v52 = vand.u32 2147483647, %v177_v43  ;;  %v192_v53 = vand.u32 2147483648, %v177_v43 }
 0x1a9   :  { %vm186_vm10 = vweird.f32 %v177_v43 }
 0x1aa   :  { %332 = vrcp.f32 %v178_v44  ;;  %v207_v56 = vand.u32 2147483648, %v178_v44  ;;  %v205_v59 = vand.u32 2147483647, %v178_v44  ;;  %v193_v60 = vor.u32 1.1754944e-38, %v192_v53 }
 0x1ab   :  { %vm191_vm13 = vcmp.eq.f32.partialorder %v190_v52, 8.507059e+37  ;;  %vm201_vm14 = vweird.f32 %v178_v44 }
 0x1ac   :  { %v208_v4 = vor.u32 1.1754944e-38, %v207_v56  ;;  %vm206_vm0 = vcmp.eq.f32.partialorder %v205_v59, 8.507059e+37 }
 0x1ae   :  { %v331_v45 = vpop.eup %330 }
 0x1af   :  { %v182_v46 = vmul.f32 %v331_v45, %v177_v43  ;;  %vm187_vm9 = vweird.f32 %v331_v45 }
 0x1b0   :  { %v333_v47 = vpop.eup %332  ;;  %v240_v48 = vpop.permute.xlu0 %239  ;;  %vm188_vm12 = vmor %vm186_vm10, %vm187_vm9  ;;  %vm232_vm10 = vcmask 1047559  }
 0x1b1   :  { %v183_v49 = vsub.f32 1.0, %v182_v46  ;;  %v197_v50 = vmul.f32 %v333_v47, %v178_v44  ;;  %v481_v51 = vrot.slane %v240_v48, 1  ;;  %334 = vrcp.f32 %v240_v48 }
 0x1b2   :  { %vm202_vm11 = vweird.f32 %v333_v47  ;;  %v255_v12 = vand.u32 2147483648, %v240_v48  ;;  %v253_v15 = vand.u32 2147483647, %v240_v48  ;;  %vm249_vm3 = vweird.f32 %v240_v48 }
 0x1b3   :  { %v184_v54 = vmul.f32 %v331_v45, %v183_v49  ;;  %v198_v55 = vsub.f32 1.0, %v197_v50  ;;  %336 = vrcp.f32 %v481_v51  ;;  %vm203_vm15 = vmor %vm201_vm14, %vm202_vm11  ;;  %v270_v18 = vand.u32 2147483648, %v481_v51 }
 0x1b4   :  { %v268_v21 = vand.u32 2147483647, %v481_v51  ;;  %v256_v23 = vor.u32 1.1754944e-38, %v255_v12  ;;  %vm254_vm8 = vcmp.eq.f32.partialorder %v253_v15, 8.507059e+37  ;;  %vm264_vm9 = vweird.f32 %v481_v51 }
 0x1b5   :  { %v185_v57 = vadd.f32 %v331_v45, %v184_v54  ;;  %v199_v58 = vmul.f32 %v333_v47, %v198_v55  ;;  %v271_v32 = vor.u32 1.1754944e-38, %v270_v18 }
 0x1b7   :  { %v335_v61 = vpop.eup %334  ;;  %v189_v62 = vsel %vm188_vm12, %v331_v45, %v185_v57  ;;  %v200_v63 = vadd.f32 %v333_v47, %v199_v58  ;;  %vm269_vm12 = vcmp.eq.f32.partialorder %v268_v21, 8.507059e+37 }
 0x1b8   :  { %v194_v1 = vsel %vm191_vm13, %v193_v60, %v189_v62  ;;  %v245_v2 = vmul.f32 %v335_v61, %v240_v48  ;;  %vm250_vm2 = vweird.f32 %v335_v61 }
 0x1b9   :  { %v337_v5 = vpop.eup %336  ;;  %v204_v6 = vsel %vm203_vm15, %v333_v47, %v200_v63  ;;  %v195_v11 = vmul.f32 %v194_v1, %v172_v0  ;;  %vm251_vm6 = vmor %vm249_vm3, %vm250_vm2 }
 0x1ba   :  { %v246_v8 = vsub.f32 1.0, %v245_v2  ;;  %v260_v9 = vmul.f32 %v337_v5, %v481_v51  ;;  %v209_v10 = vsel %vm206_vm0, %v208_v4, %v204_v6  ;;  %vm265_vm5 = vweird.f32 %v337_v5 }
 0x1bb   :  { %v210_v13 = vmul.f32 %v209_v10, %v173_v3  ;;  %v217_v24 = vadd.f32 %v479_v42, %v195_v11  ;;  %vm266_vm11 = vmor %vm264_vm9, %vm265_vm5 }
 0x1bc   :  { %v247_v14 = vmul.f32 %v335_v61, %v246_v8  ;;  %v261_v16 = vsub.f32 1.0, %v260_v9 }
 0x1bd   :  { %v218_v17 = vadd.f32 %v214_v7, %v210_v13 }
 0x1be   :  { %v248_v19 = vadd.f32 %v335_v61, %v247_v14  ;;  %v262_v20 = vmul.f32 %v337_v5, %v261_v16 }
 0x1bf   :  { %v225_v25 = vrot.slane %v218_v17, 7 }
 0x1c0   :  { %v252_v26 = vsel %vm251_vm6, %v335_v61, %v248_v19  ;;  %v263_v27 = vadd.f32 %v337_v5, %v262_v20 }
 0x1c1   :  { %v257_v29 = vsel %vm254_vm8, %v256_v23, %v252_v26  ;;  %v227_v30 = vsel %vm226_vm1, %v225_v25, %v217_v24 }
 0x1c2   :  { %v229_v33 = vsel %vm228_vm4, %v225_v25, %v227_v30  ;;  %v267_v34 = vsel %vm266_vm11, %v337_v5, %v263_v27  ;;  %v258_v38 = vmul.f32 %v257_v29, %v236_v28 }
 0x1c3   :  { %v231_v36 = vsel %vm230_vm7, %v225_v25, %v229_v33  ;;  %v272_v37 = vsel %vm269_vm12, %v271_v32, %v267_v34 }
 0x1c4   :  { %v233_v39 = vsel %vm232_vm10, %v225_v25, %v231_v36  ;;  %v273_v40 = vmul.f32 %v272_v37, %v237_v31  ;;  %v279_v42 = vadd.f32 %v275_v22, %v258_v38 }
 0x1c5   :  { %235 = vst [vmem:[#allocation9] sm:$0x3] %v233_v39 }
 0x1c6   :  { %v280_v41 = vadd.f32 %v276_v35, %v273_v40 }
 0x1c8   :  { %v285_v43 = vrot.slane %v280_v41, 7 }
 0x1ca   :  { %v286_v44 = vsel %vm226_vm1, %v285_v43, %v279_v42 }
 0x1cb   :  { %v287_v45 = vsel %vm228_vm4, %v285_v43, %v286_v44 }
 0x1cc   :  { %v288_v46 = vsel %vm230_vm7, %v285_v43, %v287_v45 }
 0x1cd   :  { %v289_v47 = vsel %vm232_vm10, %v285_v43, %v288_v46 }
 0x1ce   :  { %291 = vst [vmem:[#allocation9 + $0x2] sm:$0x3] %v289_v47 }
 0x1cf   :  { %302 = dma.vmem_to_hbm [thread:$0]  %s298_s4, 64, %s300_s11, [#allocation8]  }
 0x1d0   :  { %388 = dma.done.wait [#allocation8], 64  }
 0x1d1   :  { %389 = vsyncadd [#allocation8], 4294967232 }
 0x1d2   :  { %307 = vsyncpa [#allocation7], 1 }
 0x1d3   :  { %308 = vsyncpa [#allocation8], 1 }

</bundles_post_ra>
